<compile_context>
chip_gen: v6e
topology: v6e:2x2x1
jax: 0.10.0
libtpu: 0.0.40
codegen_flags: <defaults>
</compile_context>

<pallas_src>
import jax
import jax.numpy as jnp
from jax.experimental import pallas as pl
from jax.experimental.pallas import tpu as pltpu

_LANES = 128
# Cap per-tile bytes so input + output double-buffering (4x tile) stays far
# below every chip's default scoped-VMEM budget (16 MiB on v5e).
_MAX_TILE_BYTES = 2 * 1024 * 1024


def _identity_kernel(x_ref, o_ref):
    # Whole-tile element-wise copy (VMEM -> VMEM view of the output tile).
    o_ref[...] = x_ref[...]


def _packed_sublanes(dtype) -> int:
    # f32 -> 8 sublanes, bf16 -> 16, int8/fp8 -> 32 (sub-32-bit packs sublanes).
    itemsize = jnp.dtype(dtype).itemsize
    return 8 * max(1, 4 // max(1, itemsize))


def _pick_cols(total: int) -> int:
    """Widest lane-dense last dim (multiple of 128) that divides `total`."""
    for cols in (4096, 2048, 1024, 512, 256, 128):
        if total % cols == 0:
            return cols
    return 0


def _pick_block_rows(rows: int, cols: int, dtype) -> int:
    """Largest tile height that divides `rows`, is a multiple of the packed
    sublane count, and keeps the tile under _MAX_TILE_BYTES (or the full
    extent for small inputs)."""
    itemsize = jnp.dtype(dtype).itemsize
    sub = _packed_sublanes(dtype)
    max_rows = max(sub, _MAX_TILE_BYTES // max(1, cols * itemsize))
    max_rows -= max_rows % sub
    if rows <= max_rows:
        return rows  # full extent -> always a legal block shape
    for cand in range(max_rows, sub - 1, -sub):
        if rows % cand == 0:
            return cand
    return rows  # fallback: single full-array block


def non_batchnormal_forward(x: jax.Array) -> jax.Array:
    """Pallas implementation of Non_Batchnormal.forward (identity)."""
    orig_shape = x.shape
    total = x.size
    if total == 0:
        return x

    # Lane-dense 2-D view whenever the element count allows it.
    cols = _pick_cols(total)
    if cols:
        x2d = x.reshape(total // cols, cols)
    elif x.ndim >= 2:
        x2d = x.reshape(-1, orig_shape[-1])
    else:
        x2d = x.reshape(1, -1)

    rows, cols = x2d.shape
    block_rows = _pick_block_rows(rows, cols, x2d.dtype)
    if rows % block_rows != 0:
        block_rows = rows
    grid = (rows // block_rows,)

    out2d = pl.pallas_call(
        _identity_kernel,
        out_shape=jax.ShapeDtypeStruct(x2d.shape, x2d.dtype),
        grid=grid,
        in_specs=[pl.BlockSpec((block_rows, cols), lambda i: (i, 0))],
        out_specs=pl.BlockSpec((block_rows, cols), lambda i: (i, 0)),
        compiler_params=pltpu.CompilerParams(
            dimension_semantics=("parallel",),  # lets v7x's 2 TCs split the copy
        ),
    )(x2d)

    return out2d.reshape(orig_shape)


if __name__ == "__main__":
    key = jax.random.PRNGKey(0)
    # Small NCHW input consistent with the module's forward: (batch=2, ch=4, 16, 16)
    x = jax.random.normal(key, (2, 4, 16, 16), dtype=jnp.float32)

    fwd = jax.jit(non_batchnormal_forward)
    y = fwd(x)
    jax.block_until_ready(y)

    # Verify identity semantics against the reference (x itself).
    assert y.shape == x.shape and y.dtype == x.dtype
    assert bool(jnp.array_equal(y, x))

    print("KERNEL_OK")
</pallas_src>

<mosaic_0001>
module attributes {stable_mosaic.version = 11 : i64} {
  func.func @_identity_kernel(%arg0: i32, %arg1: memref<1x2048xf32, #tpu.memory_space<vmem>>, %arg2: memref<1x2048xf32, #tpu.memory_space<vmem>>) attributes {dimension_semantics = [#tpu.dimension_semantics<parallel>], iteration_bounds = array<i64: 1>, scalar_prefetch = 0 : i64, scratch_operands = 0 : i64, tpu.core_type = #tpu.core_type<tc>, window_params = [{transform_indices = @transform_0, window_bounds = array<i64: 1, 2048>}, {transform_indices = @transform_1, window_bounds = array<i64: 1, 2048>}]} {
    %c0 = arith.constant 0 : index
    %c0_0 = arith.constant 0 : index
    %0 = vector.load %arg1[%c0, %c0_0] : memref<1x2048xf32, #tpu.memory_space<vmem>>, vector<1x2048xf32>
    %c0_1 = arith.constant 0 : index
    %c0_2 = arith.constant 0 : index
    %1 = vector.load %arg2[%c0_1, %c0_2] : memref<1x2048xf32, #tpu.memory_space<vmem>>, vector<1x2048xf32>
    tpu.vector_store %arg2[%c0_1, %c0_2], %0 {strides = array<i32>} : memref<1x2048xf32, #tpu.memory_space<vmem>>, vector<1x2048xf32>,
    return
  }
  func.func @transform_0(%arg0: i32) -> (i32, i32) {
    %c0_i32 = arith.constant 0 : i32
    %c0_i32_0 = arith.constant 0 : i32
    return %arg0, %c0_i32 : i32, i32
  }
  func.func @transform_1(%arg0: i32) -> (i32, i32) {
    %c0_i32 = arith.constant 0 : i32
    %c0_i32_0 = arith.constant 0 : i32
    return %arg0, %c0_i32 : i32, i32
  }
}

</mosaic_0001>

<bundles_post_ra>
// kernel: non_batchnormal_forward.1
= control target key start
LH: loop header
LB: loop body
LE: loop exit
PB: predicated region body
PF: predicated region fallthrough
CT: control target
= control target key end

     0   :  { %s38_s0 = inlined_call_operand.vmem [shape: f32[1,2048], index: 0, kind: input, shape index: {}]   ;;  %s39_s1 = inlined_call_operand.vmem [shape: f32[1,2048], index: 1, kind: output, shape index: {}]  }
   0x1   :  { %v8_v0 = vld [vmem:[%s38_s0] sm:$0xff]  ;;  %v9_v1 = vld [vmem:[%s38_s0 + $0x8] sm:$0xff] }
   0x2   :  { %10 = vst [vmem:[%s39_s1] sm:$0xff] %v8_v0  ;;  %11 = vst [vmem:[%s39_s1 + $0x8] sm:$0xff] %v9_v1 }

</bundles_post_ra>
